<compile_context>
chip_gen: v7x
topology: tpu7x:2x2x1
jax: 0.10.0
libtpu: 0.0.40
codegen_flags: <defaults>
</compile_context>

<pallas_src>
import jax
import jax.numpy as jnp
from jax.experimental import pallas as pl
from jax.experimental.pallas import tpu as pltpu


def _round_up(v, m):
    return ((v + m - 1) // m) * m


def _pick_tm(M):
    """Row tile (sublane multiple of 8) minimizing padding, >=2 grid steps when possible."""
    if M <= 128:
        return _round_up(max(M, 8), 8)
    best_tm, best_pad = None, None
    for cand in (512, 256, 128):
        pad = _round_up(M, cand) - M
        if best_pad is None or pad < best_pad:
            best_tm, best_pad = cand, pad
    # Guarantee >= 2 grid steps so dimension_semantics=("parallel",...) can feed
    # both TensorCores on v7x (harmless on single-TC v5e/v6e).
    if _round_up(M, best_tm) // best_tm < 2:
        best_tm = max(128, _round_up(_round_up(M, 8) // 2, 8))
    return best_tm


def _pick_tj(mlp_pad):
    """Largest mlp_dim tile from {2048..128} that divides the padded mlp_dim."""
    for cand in (2048, 1024, 512, 256, 128):
        if mlp_pad % cand == 0:
            return cand
    return 128


def _vmem_estimate(tm, tj, dim_pad, cbytes, obytes):
    return (
        2 * tm * dim_pad * cbytes        # x tile, double-buffered
        + 2 * tm * dim_pad * obytes      # out tile, double-buffered
        + 2 * dim_pad * tj * cbytes      # W1 tile, double-buffered
        + 2 * tj * dim_pad * cbytes      # W2 tile, double-buffered
        + 2 * tj * 4                     # b1 tile (f32), double-buffered
        + dim_pad * 4                    # b2 (f32), single-buffered (Buffered(1))
        + tm * dim_pad * 4               # f32 accumulator scratch
        + tm * tj * (4 + cbytes)         # h (f32) + h cast to weight dtype
    )


def ffn_kernel(x_ref, w1_ref, b1_ref, w2_ref, b2_ref, o_ref, acc_ref):
    # x_ref : (tm, dim_pad)       row tile of flattened tokens
    # w1_ref: (dim_pad, tj)       column tile of lin1.weight.T
    # b1_ref: (1, tj)             f32
    # w2_ref: (tj, dim_pad)       row tile of lin2.weight.T
    # b2_ref: (1, dim_pad)        f32, grid-invariant (single-buffered)
    # o_ref : (tm, dim_pad)
    # acc_ref: (tm, dim_pad) f32  partial-sum accumulator across the mlp axis
    j = pl.program_id(1)

    @pl.when(j == 0)
    def _():
        acc_ref[...] = jnp.zeros_like(acc_ref)

    # Linear 1 block on the MXU with f32 accumulation; bias add in f32.
    h = jnp.dot(x_ref[...], w1_ref[...], preferred_element_type=jnp.float32)
    h = h + b1_ref[...]

    # SiLU: sigmoid on the EUP, multiply on the VPU.
    h = h * jax.nn.sigmoid(h)

    # TODO(synk): training-mode Dropout (pltpu.prng_random_bits mask) not
    # implemented; inference forward treats Dropout as identity.

    # Cast only the (tm, tj) block for the second MXU matmul, accumulate in f32.
    h = h.astype(w2_ref.dtype)
    acc_ref[...] += jnp.dot(h, w2_ref[...], preferred_element_type=jnp.float32)

    @pl.when(j == pl.num_programs(1) - 1)
    def _():
        o_ref[...] = (acc_ref[...] + b2_ref[...]).astype(o_ref.dtype)


def feedforward_forward(x, w1, b1, w2, b2, *, mxu_dtype=None):
    """FeedForward forward (eval mode).

    x: (..., dim).  w1: (dim, mlp_dim) == lin1.weight.T, b1: (mlp_dim,),
    w2: (mlp_dim, dim) == lin2.weight.T, b2: (dim,).
    mxu_dtype: optionally cast x/W1/W2 (e.g. jnp.bfloat16) for faster MXU on
    v6e/v7x; f32 accumulation is kept.  None => compute in the input dtype.
    """
    orig_shape = x.shape
    out_dtype = x.dtype
    dim = orig_shape[-1]
    mlp_dim = w1.shape[1]
    assert w1.shape == (dim, mlp_dim) and w2.shape == (mlp_dim, dim)
    assert b1.shape == (mlp_dim,) and b2.shape == (dim,)

    x2 = x.reshape(-1, dim)
    M = x2.shape[0]

    # Optional bf16 MXU-operand policy (documented precision tradeoff).
    if mxu_dtype is not None:
        x2 = x2.astype(mxu_dtype)
        w1 = w1.astype(mxu_dtype)
        w2 = w2.astype(mxu_dtype)
    compute_dtype = x2.dtype
    cbytes = jnp.dtype(compute_dtype).itemsize
    obytes = jnp.dtype(out_dtype).itemsize

    # Pad lane dims (dim, mlp_dim) up to multiples of 128 so both matmuls fill
    # the MXU and the output store stays unmasked.  Zero padding is exact:
    # padded hidden columns give SiLU(0)=0 and contribute nothing.
    dim_pad = _round_up(dim, 128)
    mlp_pad = _round_up(mlp_dim, 128)

    # Tile sizes.
    tm = _pick_tm(M)
    tj = _pick_tj(mlp_pad)

    # Generation-aware VMEM budget (v5e/v6e: 128 MiB, v7x: 64 MiB per core).
    try:
        vmem_cap = int(pltpu.get_tpu_info().vmem_capacity_bytes)
    except Exception:
        vmem_cap = 64 * 1024 * 1024
    vmem_budget = max(vmem_cap - 24 * 1024 * 1024, vmem_cap // 2)

    # Shrink tj (then tm) until the working set fits the budget.
    while _vmem_estimate(tm, tj, dim_pad, cbytes, obytes) > vmem_budget:
        if tj > 128:
            tj //= 2
        elif tm > 8:
            tm = max(8, _round_up(tm // 2, 8))
        else:
            break
    vmem_est = _vmem_estimate(tm, tj, dim_pad, cbytes, obytes)
    assert vmem_est <= vmem_budget, "tiles exceed per-core VMEM budget"
    vmem_limit = int(min(vmem_cap, max(2 * vmem_est, 32 * 1024 * 1024)))

    M_pad = _round_up(M, tm)

    # Pad operands (all zero padding).
    if M_pad != M or dim_pad != dim:
        x2 = jnp.pad(x2, ((0, M_pad - M), (0, dim_pad - dim)))
    if dim_pad != dim or mlp_pad != mlp_dim:
        w1 = jnp.pad(w1, ((0, dim_pad - dim), (0, mlp_pad - mlp_dim)))
        w2 = jnp.pad(w2, ((0, mlp_pad - mlp_dim), (0, dim_pad - dim)))
    b1_2d = jnp.pad(b1, (0, mlp_pad - mlp_dim)).reshape(1, mlp_pad).astype(jnp.float32)
    b2_2d = jnp.pad(b2, (0, dim_pad - dim)).reshape(1, dim_pad).astype(jnp.float32)

    grid = (M_pad // tm, mlp_pad // tj)

    cost = pl.CostEstimate(
        flops=4 * M_pad * dim_pad * mlp_pad,     # two matmuls
        transcendentals=M_pad * mlp_pad,         # sigmoid
        bytes_accessed=(cbytes * (M_pad * dim_pad + dim_pad * mlp_pad + mlp_pad * dim_pad)
                        + obytes * M_pad * dim_pad
                        + 4 * (mlp_pad + dim_pad)),
    )

    out = pl.pallas_call(
        ffn_kernel,
        out_shape=jax.ShapeDtypeStruct((M_pad, dim_pad), out_dtype),
        grid_spec=pltpu.PrefetchScalarGridSpec(
            num_scalar_prefetch=0,
            grid=grid,
            in_specs=[
                pl.BlockSpec((tm, dim_pad), lambda i, j: (i, 0)),    # x row tile
                pl.BlockSpec((dim_pad, tj), lambda i, j: (0, j)),    # W1 column tile
                pl.BlockSpec((1, tj), lambda i, j: (0, j)),          # b1 tile (f32)
                pl.BlockSpec((tj, dim_pad), lambda i, j: (j, 0)),    # W2 row tile
                pl.BlockSpec((1, dim_pad), lambda i, j: (0, 0),      # b2 (grid-invariant)
                             pipeline_mode=pl.Buffered(1)),
            ],
            out_specs=pl.BlockSpec((tm, dim_pad), lambda i, j: (i, 0)),
            scratch_shapes=[pltpu.VMEM((tm, dim_pad), jnp.float32)],
        ),
        compiler_params=pltpu.CompilerParams(
            dimension_semantics=("parallel", "arbitrary"),
            vmem_limit_bytes=vmem_limit,
        ),
        cost_estimate=cost,
    )(x2, w1, b1_2d, w2, b2_2d)

    if M_pad != M or dim_pad != dim:
        out = out[:M, :dim]
    return out.reshape(orig_shape)


def feedforward_reference(x, w1, b1, w2, b2):
    """Pure-JAX reference matching the PyTorch forward (eval mode)."""
    h = jnp.dot(x, w1, precision=jax.lax.Precision.HIGHEST) + b1
    h = h * jax.nn.sigmoid(h)
    return jnp.dot(h, w2, precision=jax.lax.Precision.HIGHEST) + b2


if __name__ == "__main__":
    key = jax.random.PRNGKey(0)
    k_x, k_w1, k_b1, k_w2, k_b2 = jax.random.split(key, 5)

    B, N, dim, mlp_dim = 2, 8, 32, 64  # small shapes consistent with the module
    x = jax.random.normal(k_x, (B, N, dim), dtype=jnp.float32)

    # Weights stored transposed relative to PyTorch (lin.weight.T), scaled small.
    w1 = 0.1 * jax.random.normal(k_w1, (dim, mlp_dim), dtype=jnp.float32)
    b1 = 0.1 * jax.random.normal(k_b1, (mlp_dim,), dtype=jnp.float32)
    w2 = 0.1 * jax.random.normal(k_w2, (mlp_dim, dim), dtype=jnp.float32)
    b2 = 0.1 * jax.random.normal(k_b2, (dim,), dtype=jnp.float32)

    out = feedforward_forward(x, w1, b1, w2, b2)
    out = jax.block_until_ready(out)

    ref = feedforward_reference(x, w1, b1, w2, b2)
    assert out.shape == x.shape and out.dtype == x.dtype
    assert jnp.allclose(out, ref, atol=1e-3, rtol=1e-3), "mismatch vs reference"

    print("KERNEL_OK")
</pallas_src>

<mosaic_0001>
module attributes {stable_mosaic.version = 11 : i64} {
  func.func @ffn_kernel(%arg0: i32, %arg1: i32, %arg2: memref<16x128xf32, #tpu.memory_space<vmem>>, %arg3: memref<128x128xf32, #tpu.memory_space<vmem>>, %arg4: memref<1x128xf32, #tpu.memory_space<vmem>>, %arg5: memref<128x128xf32, #tpu.memory_space<vmem>>, %arg6: memref<1x128xf32, #tpu.memory_space<vmem>>, %arg7: memref<16x128xf32, #tpu.memory_space<vmem>>, %arg8: memref<16x128xf32, #tpu.memory_space<vmem>>) attributes {dimension_semantics = [#tpu.dimension_semantics<parallel>, #tpu.dimension_semantics<arbitrary>], iteration_bounds = array<i64: 1, 1>, scalar_prefetch = 0 : i64, scratch_operands = 1 : i64, tpu.core_type = #tpu.core_type<tc>, window_params = [{transform_indices = @transform_0, window_bounds = array<i64: 16, 128>}, {transform_indices = @transform_1, window_bounds = array<i64: 128, 128>}, {transform_indices = @transform_2, window_bounds = array<i64: 1, 128>}, {transform_indices = @transform_3, window_bounds = array<i64: 128, 128>}, {pipeline_mode = #tpu.pipeline_mode<synchronous>, transform_indices = @transform_4, window_bounds = array<i64: 1, 128>}, {transform_indices = @transform_5, window_bounds = array<i64: 16, 128>}]} {
    %c0_i32 = arith.constant 0 : i32
    %0 = arith.cmpi eq, %arg1, %c0_i32 : i32
    %1 = arith.extui %0 : i1 to i32
    %c0_i32_0 = arith.constant 0 : i32
    %2 = arith.cmpi ne, %1, %c0_i32_0 : i32
    scf.if %2 {
      %cst_16 = arith.constant 0.000000e+00 : f32
      %23 = vector.broadcast %cst_16 : f32 to vector<16x128xf32>
      %c0_17 = arith.constant 0 : index
      %c0_18 = arith.constant 0 : index
      %24 = vector.load %arg8[%c0_17, %c0_18] : memref<16x128xf32, #tpu.memory_space<vmem>>, vector<16x128xf32>
      tpu.vector_store %arg8[%c0_17, %c0_18], %23 {strides = array<i32>} : memref<16x128xf32, #tpu.memory_space<vmem>>, vector<16x128xf32>,
    } else {
    }
    %c0 = arith.constant 0 : index
    %c0_1 = arith.constant 0 : index
    %3 = vector.load %arg2[%c0, %c0_1] : memref<16x128xf32, #tpu.memory_space<vmem>>, vector<16x128xf32>
    %c0_2 = arith.constant 0 : index
    %c0_3 = arith.constant 0 : index
    %4 = vector.load %arg3[%c0_2, %c0_3] : memref<128x128xf32, #tpu.memory_space<vmem>>, vector<128x128xf32>
    %cst = arith.constant dense<0.000000e+00> : vector<16x128xf32>
    %5 = tpu.matmul %3, %4, %cst {dimension_numbers = #tpu.dot_dimension_numbers<[1], [0], [0], [1], [0, 0, 1, 1], [], []>} : vector<16x128xf32>, vector<128x128xf32>, vector<16x128xf32> -> vector<16x128xf32>
    %c0_4 = arith.constant 0 : index
    %c0_5 = arith.constant 0 : index
    %6 = vector.load %arg4[%c0_4, %c0_5] : memref<1x128xf32, #tpu.memory_space<vmem>>, vector<1x128xf32>
    %7 = vector.broadcast %6 : vector<1x128xf32> to vector<16x128xf32>
    %8 = arith.addf %5, %7 : vector<16x128xf32>
    %9 = arith.negf %8 : vector<16x128xf32>
    %10 = math.exp %9 : vector<16x128xf32>
    %cst_6 = arith.constant 1.000000e+00 : f32
    %11 = vector.broadcast %cst_6 : f32 to vector<16x128xf32>
    %12 = arith.addf %11, %10 : vector<16x128xf32>
    %13 = arith.divf %11, %12 : vector<16x128xf32>
    %14 = arith.mulf %8, %13 : vector<16x128xf32>
    %c0_7 = arith.constant 0 : index
    %c0_8 = arith.constant 0 : index
    %15 = vector.load %arg8[%c0_7, %c0_8] : memref<16x128xf32, #tpu.memory_space<vmem>>, vector<16x128xf32>
    %c0_9 = arith.constant 0 : index
    %c0_10 = arith.constant 0 : index
    %16 = vector.load %arg5[%c0_9, %c0_10] : memref<128x128xf32, #tpu.memory_space<vmem>>, vector<128x128xf32>
    %cst_11 = arith.constant dense<0.000000e+00> : vector<16x128xf32>
    %17 = tpu.matmul %14, %16, %cst_11 {dimension_numbers = #tpu.dot_dimension_numbers<[1], [0], [0], [1], [0, 0, 1, 1], [], []>} : vector<16x128xf32>, vector<128x128xf32>, vector<16x128xf32> -> vector<16x128xf32>
    %18 = arith.addf %15, %17 : vector<16x128xf32>
    %c0_12 = arith.constant 0 : index
    %c0_13 = arith.constant 0 : index
    %19 = vector.load %arg8[%c0_12, %c0_13] : memref<16x128xf32, #tpu.memory_space<vmem>>, vector<16x128xf32>
    tpu.vector_store %arg8[%c0_12, %c0_13], %18 {strides = array<i32>} : memref<16x128xf32, #tpu.memory_space<vmem>>, vector<16x128xf32>,
    %c0_i32_14 = arith.constant 0 : i32
    %20 = arith.cmpi eq, %arg1, %c0_i32_14 : i32
    %21 = arith.extui %20 : i1 to i32
    %c0_i32_15 = arith.constant 0 : i32
    %22 = arith.cmpi ne, %21, %c0_i32_15 : i32
    scf.if %22 {
      %c0_16 = arith.constant 0 : index
      %c0_17 = arith.constant 0 : index
      %23 = vector.load %arg8[%c0_16, %c0_17] : memref<16x128xf32, #tpu.memory_space<vmem>>, vector<16x128xf32>
      %c0_18 = arith.constant 0 : index
      %c0_19 = arith.constant 0 : index
      %24 = vector.load %arg6[%c0_18, %c0_19] : memref<1x128xf32, #tpu.memory_space<vmem>>, vector<1x128xf32>
      %25 = vector.broadcast %24 : vector<1x128xf32> to vector<16x128xf32>
      %26 = arith.addf %23, %25 : vector<16x128xf32>
      %c0_20 = arith.constant 0 : index
      %c0_21 = arith.constant 0 : index
      %27 = vector.load %arg7[%c0_20, %c0_21] : memref<16x128xf32, #tpu.memory_space<vmem>>, vector<16x128xf32>
      tpu.vector_store %arg7[%c0_20, %c0_21], %26 {strides = array<i32>} : memref<16x128xf32, #tpu.memory_space<vmem>>, vector<16x128xf32>,
    } else {
    }
    return
  }
  func.func @transform_0(%arg0: i32, %arg1: i32) -> (i32, i32) {
    %c0_i32 = arith.constant 0 : i32
    %c0_i32_0 = arith.constant 0 : i32
    return %arg0, %c0_i32 : i32, i32
  }
  func.func @transform_1(%arg0: i32, %arg1: i32) -> (i32, i32) {
    %c0_i32 = arith.constant 0 : i32
    %c0_i32_0 = arith.constant 0 : i32
    return %c0_i32, %arg1 : i32, i32
  }
  func.func @transform_2(%arg0: i32, %arg1: i32) -> (i32, i32) {
    %c0_i32 = arith.constant 0 : i32
    %c0_i32_0 = arith.constant 0 : i32
    return %c0_i32, %arg1 : i32, i32
  }
  func.func @transform_3(%arg0: i32, %arg1: i32) -> (i32, i32) {
    %c0_i32 = arith.constant 0 : i32
    %c0_i32_0 = arith.constant 0 : i32
    return %arg1, %c0_i32 : i32, i32
  }
  func.func @transform_4(%arg0: i32, %arg1: i32) -> (i32, i32) {
    %c0_i32 = arith.constant 0 : i32
    %c0_i32_0 = arith.constant 0 : i32
    %c0_i32_1 = arith.constant 0 : i32
    return %c0_i32, %c0_i32_0 : i32, i32
  }
  func.func @transform_5(%arg0: i32, %arg1: i32) -> (i32, i32) {
    %c0_i32 = arith.constant 0 : i32
    %c0_i32_0 = arith.constant 0 : i32
    return %arg0, %c0_i32 : i32, i32
  }
}

</mosaic_0001>

<bundles_post_ra>
// kernel: tpu_custom_call.1
= control target key start
LH: loop header
LB: loop body
LE: loop exit
PB: predicated region body
PF: predicated region fallthrough
CT: control target
= control target key end

     0   :  { %10 = vsyncpa [#allocation4], 0  ;;  %s704_s0 = inlined_call_operand.hbm [shape: f32[16,128], index: 0, kind: input, shape index: {}]   ;;  %s705_s1 = inlined_call_operand.hbm [shape: f32[128,128], index: 1, kind: input, shape index: {}]   ;;  %s706_s2 = inlined_call_operand.vmem [shape: f32[1,128], index: 2, kind: input, shape index: {}]   ;;  %s707_s3 = inlined_call_operand.hbm [shape: f32[128,128], index: 3, kind: input, shape index: {}]   ;;  %s708_s4 = inlined_call_operand.vmem [shape: f32[1,128], index: 4, kind: input, shape index: {}]   ;;  %s709_s5 = inlined_call_operand.hbm [shape: f32[16,128], index: 5, kind: output, shape index: {}]  }
   0x1   :  { %11 = vsyncpa [#allocation7], 0 }
   0x2   :  { %12 = vsyncpa [#allocation5], 0  ;;  %s595_s18 = smov [#allocation6]   ;;  %s596_s20 = smov [#allocation3]  }
   0x3   :  { %s30_s19 = sshll.u32 %s595_s18, 4  ;;  %s18_s21 = sshll.u32 %s596_s20, 4  ;;  %s31_s19 = int_to_ptr.vmem [resolvable:$true] %s30_s19  ;;  %s631_s21 = int_to_ptr.vmem [resolvable:$true] %s18_s21 }
   0x4   :  { %s501_s24 = scalar_lea.hbm %s705_s1, 2048 }
   0x5   :  { %p502_p0 = scmp.ne.s32.totalorder %s705_s1, %s501_s24  ;;  %p505_p1 = scmp.lt.u32.totalorder %s501_s24, %s705_s1 }
   0x7   :  { %p507_p2 = pnand %p505_p1, %p502_p0 }
   0x9   :  { %510 = shalt.err (!%p507_p2)
}
   0xa   :  { %s511_s29 = scalar_lea.vmem %s31_s19, 2048  ;;  %p516_p4 = scmp.lt.s32.totalorder %s31_s19, %s31_s19 }
   0xb   :  { %p512_p3 = scmp.ne.s32.totalorder %s31_s19, %s511_s29  ;;  %p517_p5 = scmp.lt.s32.totalorder %s511_s29, %s511_s29 }
   0xd   :  { %p518_p6 = por %p517_p5, %p516_p4 }
   0xf   :  { %p519_p7 = pnand %p518_p6, %p512_p3 }
  0x11   :  { %522 = shalt.err (!%p519_p7)
}
  0x12   :  { %s597_s30 = smov 128   ;;  %s598_s6 = smov 8  }
  0x13   :  { %36 = dma.hbm_to_vmem [thread:$0]  %s705_s1, 2048, %s31_s19, [#allocation7], %s597_s30, %s597_s30, %s598_s6  }
  0x14   :  { %s523_s11 = scalar_lea.hbm %s704_s0, 256 }
  0x15   :  { %p524_p8 = scmp.ne.s32.totalorder %s704_s0, %s523_s11  ;;  %p527_p9 = scmp.lt.u32.totalorder %s523_s11, %s704_s0 }
  0x17   :  { %p529_p10 = pnand %p527_p9, %p524_p8 }
  0x19   :  { %532 = shalt.err (!%p529_p10)
}
  0x1a   :  { %s533_s16 = scalar_lea.vmem %s631_s21, 256  ;;  %p538_p12 = scmp.lt.s32.totalorder %s631_s21, %s631_s21 }
  0x1b   :  { %p534_p11 = scmp.ne.s32.totalorder %s631_s21, %s533_s16  ;;  %p539_p13 = scmp.lt.s32.totalorder %s533_s16, %s533_s16 }
  0x1d   :  { %p540_p0 = por %p539_p13, %p538_p12 }
  0x1f   :  { %p541_p1 = pnand %p540_p0, %p534_p11 }
  0x21   :  { %544 = shalt.err (!%p541_p1)
}
  0x22   :  { %24 = dma.hbm_to_vmem [thread:$0]  %s704_s0, 256, %s631_s21, [#allocation4], %s597_s30, %s597_s30, %s598_s6  }
  0x23   :  { %s599_s18 = smov [#allocation8]   ;;  %s545_s23 = scalar_lea.hbm %s707_s3, 2048 }
  0x24   :  { %s44_s19 = sshll.u32 %s599_s18, 4  ;;  %p546_p2 = scmp.ne.s32.totalorder %s707_s3, %s545_s23  ;;  %s45_s19 = int_to_ptr.vmem [resolvable:$true] %s44_s19 }
  0x25   :  { %p549_p3 = scmp.lt.u32.totalorder %s545_s23, %s707_s3 }
  0x27   :  { %p551_p4 = pnand %p549_p3, %p546_p2 }
  0x29   :  { %554 = shalt.err (!%p551_p4)
}
  0x2a   :  { %s555_s28 = scalar_lea.vmem %s45_s19, 2048  ;;  %p560_p6 = scmp.lt.s32.totalorder %s45_s19, %s45_s19 }
  0x2b   :  { %p556_p5 = scmp.ne.s32.totalorder %s45_s19, %s555_s28  ;;  %p561_p7 = scmp.lt.s32.totalorder %s555_s28, %s555_s28 }
  0x2d   :  { %p562_p8 = por %p561_p7, %p560_p6 }
  0x2f   :  { %p563_p9 = pnand %p562_p8, %p556_p5 }
  0x31   :  { %566 = shalt.err (!%p563_p9)
}
  0x32   :  { %50 = dma.hbm_to_vmem [thread:$0]  %s707_s3, 2048, %s45_s19, [#allocation7], %s597_s30, %s597_s30, %s598_s6  }
  0x33   :  { %589 = dma.done.wait [#allocation4], 256  }
  0x34   :  { %590 = vsyncadd [#allocation4], 4294967040 }
  0x35   :  { %591 = dma.done.wait [#allocation7], 4096  }
  0x36   :  { %592 = vsyncadd [#allocation7], 4294963200  ;;  %v70_v0 = vld [vmem:[#allocation6] sm:$0xff]  ;;  %v71_v1 = vld [vmem:[#allocation6 + $0x8] sm:$0xff]  ;;  %s600_s8 = smov [#allocation9]  }
  0x37   :  { %v72_v2 = vld [vmem:[#allocation6 + $0x10] sm:$0xff]  ;;  %v423_v3 = vpack.c.bf16 %v71_v1, %v70_v0  ;;  %v73_v4 = vld [vmem:[#allocation6 + $0x18] sm:$0xff]  ;;  %v74_v6 = vld [vmem:[#allocation6 + $0x20] sm:$0xff]  ;;  %s300_s9 = sshll.u32 %s600_s8, 4  ;;  %s301_s9 = int_to_ptr.vmem [resolvable:$true] %s300_s9 }
  0x38   :  { %v427_v5 = vpack.c.bf16 %v73_v4, %v72_v2  ;;  %v75_v7 = vld [vmem:[#allocation6 + $0x28] sm:$0xff]  ;;  %v68_v9 = vld [vmem:[#allocation3] sm:$0xff]  ;;  %v77_v11 = vld [vmem:[#allocation6 + $0x38] sm:$0xff]  ;;  %s567_s10 = scalar_lea.vmem %s301_s9, 256  ;;  %p572_p11 = scmp.lt.s32.totalorder %s301_s9, %s301_s9 }
  0x39   :  { %424 = vmatprep.subr.bf16.mxu0 %v423_v3  ;;  %v431_v8 = vpack.c.bf16 %v75_v7, %v74_v6  ;;  %v76_v10 = vld [vmem:[#allocation6 + $0x30] sm:$0xff]  ;;  %385 = vmatprep.mubr.f32.mxu0 %v68_v9  ;;  %v78_v13 = vld [vmem:[#allocation6 + $0x40] sm:$0xff]  ;;  %v79_v14 = vld [vmem:[#allocation6 + $0x48] sm:$0xff]  ;;  %p568_p10 = scmp.ne.s32.totalorder %s301_s9, %s567_s10  ;;  %p573_p12 = scmp.lt.s32.totalorder %s567_s10, %s567_s10 }
  0x3a   :  { %426 = vmatpush3.bf16.msra.mxu0 %v423_v3  ;;  %v435_v12 = vpack.c.bf16 %v77_v11, %v76_v10  ;;  %v439_v15 = vpack.c.bf16 %v79_v14, %v78_v13  ;;  %v80_v16 = vld [vmem:[#allocation6 + $0x50] sm:$0xff]  ;;  %v81_v17 = vld [vmem:[#allocation6 + $0x58] sm:$0xff]  ;;  %v82_v19 = vld [vmem:[#allocation6 + $0x60] sm:$0xff] }
  0x3b   :  { %428 = vmatprep.subr.bf16.mxu0 %v427_v5  ;;  %v443_v18 = vpack.c.bf16 %v81_v17, %v80_v16  ;;  %v83_v20 = vld [vmem:[#allocation6 + $0x68] sm:$0xff]  ;;  %v84_v22 = vld [vmem:[#allocation6 + $0x70] sm:$0xff]  ;;  %v85_v23 = vld [vmem:[#allocation6 + $0x78] sm:$0xff]  ;;  %p574_p13 = por %p573_p12, %p572_p11 }
  0x3c   :  { %v447_v21 = vpack.c.bf16 %v83_v20, %v82_v19  ;;  %v451_v24 = vpack.c.bf16 %v85_v23, %v84_v22  ;;  %v69_v25 = vld [vmem:[#allocation3 + $0x8] sm:$0xff]  ;;  %v184_v26 = vld [vmem:[#allocation8] sm:$0xff]  ;;  %v185_v27 = vld [vmem:[#allocation8 + $0x8] sm:$0xff] }
  0x3d   :  { %v455_v28 = vpack.c.bf16 %v185_v27, %v184_v26  ;;  %v186_v29 = vld [vmem:[#allocation8 + $0x10] sm:$0xff]  ;;  %v187_v30 = vld [vmem:[#allocation8 + $0x18] sm:$0xff]  ;;  %v188_v32 = vld [vmem:[#allocation8 + $0x20] sm:$0xff]  ;;  %p575_p0 = pnand %p574_p13, %p568_p10 }
  0x3e   :  { %430 = vmatpush3.bf16.msra.mxu0 %v427_v5  ;;  %v459_v31 = vpack.c.bf16 %v187_v30, %v186_v29  ;;  %v189_v33 = vld [vmem:[#allocation8 + $0x28] sm:$0xff]  ;;  %v190_v35 = vld [vmem:[#allocation8 + $0x30] sm:$0xff]  ;;  %v191_v36 = vld [vmem:[#allocation8 + $0x38] sm:$0xff] }
  0x3f   :  { %432 = vmatprep.subr.bf16.mxu0 %v431_v8  ;;  %456 = vmatprep.subr.bf16.mxu1 %v455_v28  ;;  %v463_v34 = vpack.c.bf16 %v189_v33, %v188_v32  ;;  %v467_v37 = vpack.c.bf16 %v191_v36, %v190_v35  ;;  %v192_v38 = vld [vmem:[#allocation8 + $0x40] sm:$0xff]  ;;  %v193_v39 = vld [vmem:[#allocation8 + $0x48] sm:$0xff]  ;;  %v194_v41 = vld [vmem:[#allocation8 + $0x50] sm:$0xff] }
  0x40   :  { %458 = vmatpush3.bf16.msra.mxu1 %v455_v28  ;;  %v471_v40 = vpack.c.bf16 %v193_v39, %v192_v38  ;;  %v195_v42 = vld [vmem:[#allocation8 + $0x58] sm:$0xff]  ;;  %v196_v44 = vld [vmem:[#allocation8 + $0x60] sm:$0xff]  ;;  %v197_v45 = vld [vmem:[#allocation8 + $0x68] sm:$0xff] }
  0x41   :  { %460 = vmatprep.subr.bf16.mxu1 %v459_v31  ;;  %v475_v43 = vpack.c.bf16 %v195_v42, %v194_v41  ;;  %v479_v46 = vpack.c.bf16 %v197_v45, %v196_v44  ;;  %v198_v47 = vld [vmem:[#allocation8 + $0x70] sm:$0xff]  ;;  %v199_v48 = vld [vmem:[#allocation8 + $0x78] sm:$0xff] }
  0x42   :  { %434 = vmatpush3.bf16.msra.mxu0 %v431_v8  ;;  %v483_v49 = vpack.c.bf16 %v199_v48, %v198_v47  ;;  %v313_v50 = vld [vmem:[%s706_s2] ss:$0 sm:$0xff] }
  0x43   :  { %436 = vmatprep.subr.bf16.mxu0 %v435_v12  ;;  %v316_v1 = vld [vmem:[%s708_s4] ss:$0 sm:$0xff] }
  0x44   :  { %462 = vmatpush3.bf16.msra.mxu1 %v459_v31 }
  0x45   :  { %464 = vmatprep.subr.bf16.mxu1 %v463_v34 }
  0x46   :  { %438 = vmatpush3.bf16.msra.mxu0 %v435_v12 }
  0x47   :  { %440 = vmatprep.subr.bf16.mxu0 %v439_v15 }
  0x48   :  { %466 = vmatpush3.bf16.msra.mxu1 %v463_v34 }
  0x49   :  { %468 = vmatprep.subr.bf16.mxu1 %v467_v37 }
  0x4a   :  { %442 = vmatpush3.bf16.msra.mxu0 %v439_v15 }
  0x4b   :  { %444 = vmatprep.subr.bf16.mxu0 %v443_v18 }
  0x4c   :  { %470 = vmatpush3.bf16.msra.mxu1 %v467_v37 }
  0x4d   :  { %472 = vmatprep.subr.bf16.mxu1 %v471_v40 }
  0x4e   :  { %446 = vmatpush3.bf16.msra.mxu0 %v443_v18 }
  0x4f   :  { %448 = vmatprep.subr.bf16.mxu0 %v447_v21 }
  0x50   :  { %474 = vmatpush3.bf16.msra.mxu1 %v471_v40 }
  0x51   :  { %476 = vmatprep.subr.bf16.mxu1 %v475_v43 }
  0x52   :  { %450 = vmatpush3.bf16.msra.mxu0 %v447_v21 }
  0x53   :  { %452 = vmatprep.subr.bf16.mxu0 %v451_v24 }
  0x54   :  { %478 = vmatpush3.bf16.msra.mxu1 %v475_v43 }
  0x55   :  { %480 = vmatprep.subr.bf16.mxu1 %v479_v46 }
  0x56   :  { %454 = vmatpush3.bf16.msra.mxu0 %v451_v24 }
  0x58   :  { %482 = vmatpush3.bf16.msra.mxu1 %v479_v46 }
  0x59   :  { %386 = vmatmul.mubr.f32.vlgmr.msra.gmra.mrb[0].mxu0 %v69_v25  ;;  %484 = vmatprep.subr.bf16.mxu1 %v483_v49 }
  0x5c   :  { %486 = vmatpush3.bf16.msra.mxu1 %v483_v49 }
 0x12c   :  { %v387_v51 = vpop.f32.mrb[0].mxu0 }
 0x12d   :  { %v165_v52 = vadd.f32 %v387_v51, %v313_v50  ;;  %v159_v53 = vpop.f32.mrb[1].mxu0 }
 0x12e   :  { %v160_v54 = vadd.f32 %v313_v50, %v159_v53 }
 0x12f   :  { %v315_v55 = vmul.f32 -1.442695, %v165_v52 }
 0x130   :  { %v314_v56 = vmul.f32 -1.442695, %v160_v54 }
 0x131   :  { %493 = vpow2.f32 %v315_v55 }
 0x132   :  { %495 = vpow2.f32 %v314_v56 }
 0x13b   :  { %v494_v57 = vpop.eup %493 }
 0x13c   :  { %v496_v58 = vpop.eup %495  ;;  %v175_v59 = vadd.f32 1.0, %v494_v57 }
 0x13d   :  { %v174_v60 = vadd.f32 1.0, %v496_v58 }
 0x13e   :  { %497 = vrcp.f32 %v175_v59 }
 0x13f   :  { %499 = vrcp.f32 %v174_v60 }
 0x148   :  { %v498_v61 = vpop.eup %497 }
 0x149   :  { %v500_v62 = vpop.eup %499  ;;  %v181_v0 = vmul.f32 %v498_v61, %v165_v52 }
 0x14a   :  { %v180_v63 = vmul.f32 %v500_v62, %v160_v54 }
 0x14c   :  { %420 = vmatprep.mubr.f32.mxu1 %v180_v63 }
 0x14d   :  { %421 = vmatmul.mubr.f32.vlgmr.msra.gmra.mrb[0].mxu1 %v181_v0 }
 0x220   :  { %v422_v2 = vpop.f32.mrb[0].mxu1 }
 0x221   :  { %v292_v3 = vadd.f32 %v422_v2, %v316_v1  ;;  %v266_v4 = vpop.f32.mrb[1].mxu1 }
 0x222   :  { %v291_v5 = vadd.f32 %v316_v1, %v266_v4 }
 0x223   :  { %294 = vst [vmem:[#allocation9 + $0x8] sm:$0xff] %v292_v3 }
 0x224   :  { %293 = vst [vmem:[#allocation9] sm:$0xff] %v291_v5 }
 0x225   :  { %578 = shalt.err (!%p575_p0)
}
 0x226   :  { %s579_s4 = scalar_lea.hbm %s709_s5, 256 }
 0x227   :  { %p580_p1 = scmp.ne.s32.totalorder %s709_s5, %s579_s4  ;;  %p583_p2 = scmp.lt.u32.totalorder %s579_s4, %s709_s5 }
 0x229   :  { %p585_p3 = pnand %p583_p2, %p580_p1 }
 0x22b   :  { %588 = shalt.err (!%p585_p3)
}
 0x22c   :  { %306 = dma.vmem_to_hbm [thread:$0]  %s301_s9, 256, %s709_s5, [#allocation5], %s597_s30, %s597_s30, %s598_s6  }
 0x22d   :  { %593 = dma.done.wait [#allocation5], 256  }
 0x22e   :  { %594 = vsyncadd [#allocation5], 4294967040 }
 0x22f   :  { %310 = vsyncpa [#allocation4], 1 }
 0x230   :  { %311 = vsyncpa [#allocation7], 1 }
 0x231   :  { %312 = vsyncpa [#allocation5], 1 }

</bundles_post_ra>
